<compile_context>
chip_gen: v6e
topology: v6e:2x2x1
jax: 0.10.0
libtpu: 0.0.40
codegen_flags: <defaults>
</compile_context>

<pallas_src>
import functools
import math

import numpy as np
import jax
import jax.numpy as jnp
from jax import lax
from jax.experimental import pallas as pl
from jax.experimental.pallas import tpu as pltpu


def make_positional_encoding(n, d_model):
    """Deterministic sinusoidal PE table, identical to the PyTorch __init__."""
    pe = np.zeros((n, d_model), dtype=np.float32)
    pos = np.arange(n, dtype=np.float64)[:, None]              # (n, 1)
    i = np.arange(d_model // 2, dtype=np.float64)[None, :]     # (1, d/2)
    denom = np.power(10000.0, 2.0 * i / d_model)                # (1, d/2)
    pe[:, 0::2] = np.sin(pos / denom)
    pe[:, 1::2] = np.cos(pos / denom)
    return jnp.asarray(pe)


def posenc_kernel(seed_ref, x_ref, pe_ref, o_ref, *, p_drop, training, nd_total):
    # x_ref : (TB, TC) lane-dense tile of the flattened (B, N*D) input
    # pe_ref: (1, TC)  matching slice of the flattened PE table (broadcast over rows)
    x = x_ref[...]
    y = x + pe_ref[...]                      # X + PE  (row broadcast)

    if training and p_drop > 0.0:
        tb, tc = x_ref.shape
        row0 = pl.program_id(0) * tb
        col0 = pl.program_id(1) * tc
        rows = lax.broadcasted_iota(jnp.int32, (tb, tc), 0) + row0
        cols = lax.broadcasted_iota(jnp.int32, (tb, tc), 1) + col0
        # Global element index (mod 2^32) -> counter for the hash.
        idx = rows.astype(jnp.uint32) * jnp.uint32(nd_total) + cols.astype(jnp.uint32)
        seed = (seed_ref[0].astype(jnp.uint32) * jnp.uint32(0x9E3779B1)
                + jnp.uint32(0x85EBCA77))
        h = idx ^ seed
        # murmur3-style xorshift-multiply finalizer: good per-element decorrelation.
        h = h ^ (h >> 16)
        h = h * jnp.uint32(0x7FEB352D)
        h = h ^ (h >> 15)
        h = h * jnp.uint32(0x846CA68B)
        h = h ^ (h >> 16)
        # Direct uint32 threshold compare: keep with probability (1 - p_drop).
        thresh = jnp.uint32(min(int(round(p_drop * 2.0 ** 32)), 2 ** 32 - 1))
        keep = h >= thresh
        y = jnp.where(keep, y * jnp.float32(1.0 / (1.0 - p_drop)), jnp.float32(0.0))

    o_ref[...] = (x + y).astype(o_ref.dtype)   # X + dropout(X + PE)


def pos_enc_forward(x, pe, *, p_drop=0.1, training=True, seed=0):
    """Pallas implementation of PosEnc.forward. x: (B, N, D), pe: (>=N, >=D)."""
    assert 0.0 <= p_drop < 1.0, "p_drop must be in [0, 1)"
    B, N, D = x.shape
    assert pe.shape[0] >= N and pe.shape[1] >= D
    pe = pe[:N, :D]

    # Lane-dense 2-D view: fold N and D so the last (lane) dim is a big multiple
    # of 128 whenever possible.
    ND = N * D
    x2 = x.reshape(B, ND)
    pe2 = pe.reshape(1, ND)

    LANE = 128
    if ND % LANE == 0:
        tc = LANE
        # Grow the column tile while it still divides ND (no edge blocks);
        # cap at 64K f32 columns (~256 KiB per row) to stay well inside VMEM
        # even on v7x (64 MiB physical / 32 MiB default scoped).
        while tc * 2 <= min(ND, 65536) and ND % (tc * 2) == 0:
            tc *= 2
    else:
        # Full-extent last dim is always a legal block shape (small shapes only).
        tc = ND

    # Row tile: full batch if small, otherwise a multiple of 8 sized so a block
    # stays around 2 MiB of f32 (double-buffered in/out blocks + PE slice fit
    # comfortably in scoped VMEM on every generation).
    max_rows = max(8, (2 * 1024 * 1024) // (tc * 4))
    if B <= max_rows:
        tb = B
    else:
        tb = (max_rows // 8) * 8
        while tb > 8 and B % tb != 0:
            tb -= 8

    grid = (pl.cdiv(B, tb), pl.cdiv(ND, tc))
    seed_arr = jnp.array([seed], dtype=jnp.int32)

    kernel = functools.partial(
        posenc_kernel, p_drop=float(p_drop), training=bool(training), nd_total=ND)

    out2 = pl.pallas_call(
        kernel,
        out_shape=jax.ShapeDtypeStruct((B, ND), x.dtype),
        grid_spec=pltpu.PrefetchScalarGridSpec(
            num_scalar_prefetch=1,                     # seed -> SMEM
            grid=grid,
            in_specs=[
                pl.BlockSpec((tb, tc), lambda i, j, seed: (i, j)),   # x
                pl.BlockSpec((1, tc), lambda i, j, seed: (0, j)),    # pe (row-bcast)
            ],
            out_specs=pl.BlockSpec((tb, tc), lambda i, j, seed: (i, j)),
        ),
        compiler_params=pltpu.CompilerParams(
            dimension_semantics=("parallel", "parallel")),
    )(seed_arr, x2, pe2)

    return out2.reshape(B, N, D)


if __name__ == "__main__":
    B, N, D = 2, 8, 32      # BATCH_SZ, sequence length, d_model
    n_table = 16            # PE table length (>= N), as in the module's `n`

    key = jax.random.PRNGKey(0)
    x = jax.random.normal(key, (B, N, D), dtype=jnp.float32)
    pe = make_positional_encoding(n_table, D)

    # Eval-mode check (dropout = identity): output must equal 2*X + PE.
    out_eval = jax.block_until_ready(
        pos_enc_forward(x, pe, p_drop=0.1, training=False))
    x_np = np.asarray(x)
    pe_np = np.asarray(pe)[:N, :D]
    expected = 2.0 * x_np + pe_np[None, :, :]
    np.testing.assert_allclose(np.asarray(out_eval), expected, rtol=1e-6, atol=1e-6)

    # Training-mode check: every element must be either X (dropped)
    # or X + (X + PE)/(1 - p) (kept, inverted-dropout scaling).
    p = 0.1
    out_train = jax.block_until_ready(
        pos_enc_forward(x, pe, p_drop=p, training=True, seed=1234))
    assert out_train.shape == (B, N, D)
    ot = np.asarray(out_train)
    dropped_val = x_np
    kept_val = x_np + (x_np + pe_np[None, :, :]) / (1.0 - p)
    ok = (np.isclose(ot, dropped_val, rtol=1e-5, atol=1e-5)
          | np.isclose(ot, kept_val, rtol=1e-5, atol=1e-5))
    assert ok.all(), "training-mode output not in {X, X + (X+PE)/(1-p)}"

    print("KERNEL_OK")
</pallas_src>

<mosaic_0001>
module attributes {stable_mosaic.version = 11 : i64} {
  func.func @posenc_kernel(%arg0: i32, %arg1: i32, %arg2: memref<1xi32, #tpu.memory_space<smem>>, %arg3: memref<2x256xf32, #tpu.memory_space<vmem>>, %arg4: memref<1x256xf32, #tpu.memory_space<vmem>>, %arg5: memref<2x256xf32, #tpu.memory_space<vmem>>) attributes {dimension_semantics = [#tpu.dimension_semantics<parallel>, #tpu.dimension_semantics<parallel>], iteration_bounds = array<i64: 1, 1>, scalar_prefetch = 1 : i64, scratch_operands = 0 : i64, tpu.core_type = #tpu.core_type<tc>, window_params = [{transform_indices = @transform_0, window_bounds = array<i64: 2, 256>}, {transform_indices = @transform_1, window_bounds = array<i64: 1, 256>}, {transform_indices = @transform_2, window_bounds = array<i64: 2, 256>}]} {
    %c0 = arith.constant 0 : index
    %c0_0 = arith.constant 0 : index
    %0 = vector.load %arg3[%c0, %c0_0] : memref<2x256xf32, #tpu.memory_space<vmem>>, vector<2x256xf32>
    %c0_1 = arith.constant 0 : index
    %c0_2 = arith.constant 0 : index
    %1 = vector.load %arg4[%c0_1, %c0_2] : memref<1x256xf32, #tpu.memory_space<vmem>>, vector<1x256xf32>
    %2 = vector.broadcast %1 : vector<1x256xf32> to vector<2x256xf32>
    %3 = arith.addf %0, %2 : vector<2x256xf32>
    %4 = arith.addf %0, %3 : vector<2x256xf32>
    %c0_3 = arith.constant 0 : index
    %c0_4 = arith.constant 0 : index
    %5 = vector.load %arg5[%c0_3, %c0_4] : memref<2x256xf32, #tpu.memory_space<vmem>>, vector<2x256xf32>
    tpu.vector_store %arg5[%c0_3, %c0_4], %4 {strides = array<i32>} : memref<2x256xf32, #tpu.memory_space<vmem>>, vector<2x256xf32>,
    return
  }
  func.func @transform_0(%arg0: i32, %arg1: i32, %arg2: memref<1xi32, #tpu.memory_space<smem>>) -> (i32, i32) {
    %c0_i32 = arith.constant 0 : i32
    return %arg0, %arg1 : i32, i32
  }
  func.func @transform_1(%arg0: i32, %arg1: i32, %arg2: memref<1xi32, #tpu.memory_space<smem>>) -> (i32, i32) {
    %c0_i32 = arith.constant 0 : i32
    %c0_i32_0 = arith.constant 0 : i32
    return %c0_i32, %arg1 : i32, i32
  }
  func.func @transform_2(%arg0: i32, %arg1: i32, %arg2: memref<1xi32, #tpu.memory_space<smem>>) -> (i32, i32) {
    %c0_i32 = arith.constant 0 : i32
    return %arg0, %arg1 : i32, i32
  }
}

</mosaic_0001>

<bundles_post_ra>
// kernel: tpu_custom_call.1
= control target key start
LH: loop header
LB: loop body
LE: loop exit
PB: predicated region body
PF: predicated region fallthrough
CT: control target
= control target key end

     0   :  { %9 = vsyncpa [#allocation5], 0  ;;  %s143_s0 = inlined_call_operand.<no memory space> [shape: s32[1], index: 0, kind: input, shape index: {}]   ;;  %s144_s1 = inlined_call_operand.hbm [shape: f32[2,256], index: 1, kind: input, shape index: {}]   ;;  %s145_s2 = inlined_call_operand.vmem [shape: f32[1,256], index: 2, kind: input, shape index: {}]   ;;  %s146_s3 = inlined_call_operand.hbm [shape: f32[2,256], index: 3, kind: output, shape index: {}]  }
   0x1   :  { %10 = vsyncpa [#allocation6], 0  ;;  %s111_s12 = smov [#allocation4]  }
   0x2   :  { %s17_s13 = sshll.u32 %s111_s12, 4  ;;  %s18_s13 = int_to_ptr.vmem [resolvable:$true] %s17_s13 }
   0x3   :  { %s75_s14 = scalar_lea.vmem %s18_s13, 64  ;;  %p80_p1 = scmp.lt.s32.totalorder %s18_s13, %s18_s13 }
   0x4   :  { %p76_p0 = scmp.ne.s32.totalorder %s18_s13, %s75_s14  ;;  %p81_p2 = scmp.lt.s32.totalorder %s75_s14, %s75_s14 }
   0x6   :  { %p82_p3 = por %p81_p2, %p80_p1 }
   0x8   :  { %p83_p4 = pnand %p82_p3, %p76_p0 }
   0xa   :  { %86 = shalt.err (!%p83_p4)
}
   0xb   :  { %20 = dma.hbm_to_vmem [thread:$0]  %s144_s1, 64, %s18_s13, [#allocation5]  }
   0xc   :  { %107 = dma.done.wait [#allocation5], 64  }
   0xd   :  { %108 = vsyncadd [#allocation5], 4294967232  ;;  %v29_v0 = vlaneseq  ;;  %v112_v1 = vmov 1983009808   ;;  %v27_v7 = vld [vmem:[%s145_s2] sm:$0x3] }
   0xe   :  { %v39_v2 = vunpack.c.l.s4 %v112_v1  ;;  %v26_v12 = vld [vmem:[#allocation4] sm:$0xf]  ;;  %s113_s1 = smov [#allocation7]  }
   0xf   :  { %v30_v3 = vshrl.u32 %v29_v0, 7  ;;  %s55_s18 = sshll.u32 %s113_s1, 4  ;;  %s56_s18 = int_to_ptr.vmem [resolvable:$true] %s55_s18 }
  0x10   :  { %v40_v6 = vunpack.c.0.s8 %v39_v2  ;;  %s87_s19 = scalar_lea.vmem %s56_s18, 64  ;;  %p92_p6 = scmp.lt.s32.totalorder %s56_s18, %s56_s18 }
  0x11   :  { %v31_v4 = vsub.s32 0, %v30_v3  ;;  %v35_v5 = vsub.s32 1, %v30_v3  ;;  %p88_p5 = scmp.ne.s32.totalorder %s56_s18, %s87_s19  ;;  %p93_p7 = scmp.lt.s32.totalorder %s87_s19, %s87_s19 }
  0x12   :  { %v43_v10 = vsub.s32 %v40_v6, %v30_v3 }
  0x13   :  { %v32_v8 = vrot.slane %v27_v7, %v31_v4  ;;  %v36_v9 = vrot.slane %v27_v7, %v35_v5  ;;  %p94_p8 = por %p93_p7, %p92_p6 }
  0x15   :  { %v37_v11 = vcombine.low %v32_v8, %v36_v9  ;;  %p95_p9 = pnand %p94_p8, %p88_p5 }
  0x17   :  { %v44_v13 = vrot.slane %v37_v11, %v43_v10 }
  0x19   :  { %v46_v14 = vadd.f32 %v44_v13, %v26_v12 }
  0x1b   :  { %v47_v15 = vadd.f32 %v46_v14, %v26_v12 }
  0x1d   :  { %48 = vst [vmem:[#allocation7] sm:$0xf] %v47_v15 }
  0x1e   :  { %98 = shalt.err (!%p95_p9)
}
  0x1f   :  { %58 = dma.vmem_to_hbm [thread:$0]  %s56_s18, 64, %s146_s3, [#allocation6]  }
  0x20   :  { %109 = dma.done.wait [#allocation6], 64  }
  0x21   :  { %110 = vsyncadd [#allocation6], 4294967232 }
  0x22   :  { %62 = vsyncpa [#allocation5], 1 }
  0x23   :  { %63 = vsyncpa [#allocation6], 1 }

</bundles_post_ra>
